<compile_context>
chip_gen: v7x
topology: tpu7x:2x2x1
jax: 0.10.0
libtpu: 0.0.40
codegen_flags: <defaults>
</compile_context>

<pallas_src>
import functools
import math

import jax
import jax.numpy as jnp
from jax import lax
from jax.experimental import pallas as pl
from jax.experimental.pallas import tpu as pltpu

EPS = 1e-5


def _round_up(v, m):
    return ((v + m - 1) // m) * m


def _feature_embedding_kernel(x_ref, w1_ref, b1_ref, g1_ref, be1_ref,
                              w2_ref, b2_ref, g2_ref, be2_ref, pe_ref, o_ref,
                              *, inv_hidden, inv_d):
    # Linear 1: cast activations to bf16 in-kernel (no wrapper pad/cast pass),
    # bf16 MXU operands, f32 accumulate.
    h = jnp.dot(x_ref[...].astype(jnp.bfloat16), w1_ref[...],
                preferred_element_type=jnp.float32) + b1_ref[...]
    # Fused LayerNorm(2*d_model): single pass for mean and E[h^2].
    mu = jnp.sum(h, axis=-1, keepdims=True) * inv_hidden
    ms = jnp.sum(h * h, axis=-1, keepdims=True) * inv_hidden
    var = jnp.maximum(ms - mu * mu, 0.0)
    h = (h - mu) * lax.rsqrt(var + EPS) * g1_ref[...] + be1_ref[...]
    # ReLU
    h = jnp.maximum(h, 0.0)
    # TODO(synk): nn.Dropout is identity in eval mode; training-mode dropout not implemented.
    # Linear 2: bf16 operands, f32 accumulate.
    y = jnp.dot(h.astype(jnp.bfloat16), w2_ref[...],
                preferred_element_type=jnp.float32) + b2_ref[...]
    # Fused LayerNorm(d_model)
    mu2 = jnp.sum(y, axis=-1, keepdims=True) * inv_d
    ms2 = jnp.sum(y * y, axis=-1, keepdims=True) * inv_d
    var2 = jnp.maximum(ms2 - mu2 * mu2, 0.0)
    y = (y - mu2) * lax.rsqrt(var2 + EPS) * g2_ref[...] + be2_ref[...]
    # Positional encoding: one pe row per batch element (PyTorch pe[:x.size(0)]),
    # broadcast over the sequence-tile rows.
    o_ref[...] = (y + pe_ref[...]).astype(o_ref.dtype)


def feature_embedding_forward(x, params, pe_rows, *, tile_s=1024):
    """x: [B, S, input_dim] float32.  pe_rows: [B, d_model] float32 (= pe[:B, 0, :])."""
    B, S, din = x.shape
    hidden = params["w1"].shape[1]           # 2 * d_model
    d_model = params["w2"].shape[1]

    # ---- parameters: one-time bf16/f32 casts, no padding anywhere ------------------
    w1 = params["w1"].astype(jnp.bfloat16)
    w2 = params["w2"].astype(jnp.bfloat16)
    b1 = params["b1"].astype(jnp.float32)
    g1 = params["g1"].astype(jnp.float32)
    be1 = params["be1"].astype(jnp.float32)
    b2 = params["b2"].astype(jnp.float32)
    g2 = params["g2"].astype(jnp.float32)
    be2 = params["be2"].astype(jnp.float32)
    pe3 = pe_rows.astype(jnp.float32)[:, None, :]   # [B, 1, d_model] — tiny input

    # ---- sequence-axis tiling: every row tile stays inside one batch element so the
    # pe BlockSpec can index by batch.  No M padding; Pallas clips a ragged last tile.
    if S <= tile_s:
        ts = S                                   # full extent: always a legal block dim
    else:
        ts = max(8, (tile_s // 8) * 8)           # sub-block: keep sublane-aligned
    n_s = pl.cdiv(S, ts)
    # v7x megacore: make sure the parallel grid has >= 2 steps when possible.
    if B * n_s < 2 and S >= 16:
        ts = _round_up(pl.cdiv(S, 2), 8)
        n_s = pl.cdiv(S, ts)
    grid = (B, n_s)

    inv_hidden = 1.0 / float(hidden)             # LN denominators use the REAL dims
    inv_d = 1.0 / float(d_model)
    kernel = functools.partial(_feature_embedding_kernel,
                               inv_hidden=inv_hidden, inv_d=inv_d)

    # ---- VMEM budget: capped below physical VMEM with pipeline headroom ------------
    vmem_estimate = (
        2 * ts * din * 4                          # x tile (double-buffered, f32)
        + 2 * ts * d_model * 4                    # output tile (double-buffered, f32)
        + 2 * 2 * (din * hidden + hidden * d_model)   # bf16 weights (worst case 2x)
        + 2 * 4 * 3 * (hidden + d_model)          # bias / gamma / beta rows
        + 4 * ts * hidden + 4 * ts * d_model      # f32 intermediates
        + 2 * 4 * d_model                         # pe row
        + (1 << 20)
    )
    try:
        vmem_cap = int(pltpu.get_tpu_info().vmem_capacity_bytes)
    except Exception:
        vmem_cap = 64 * 2**20                     # conservative (v7x per-core VMEM)
    ceiling = max(16 * 2**20, vmem_cap - 12 * 2**20)
    vmem_limit = int(min(ceiling, max(32 * 2**20, 2 * vmem_estimate)))

    # ---- advisory cost estimate for XLA scheduling around the custom call ----------
    flops = 2 * B * S * (din * hidden + hidden * d_model)
    param_bytes = (2 * (din * hidden + hidden * d_model)
                   + 4 * 3 * (hidden + d_model) + 4 * B * d_model)
    bytes_accessed = 4 * B * S * din + 4 * B * S * d_model + param_bytes
    cost = pl.CostEstimate(flops=int(flops), transcendentals=int(2 * B * S),
                           bytes_accessed=int(bytes_accessed))

    def _build(single_buffer_weights):
        if single_buffer_weights:
            def inv_spec(shape):
                return pl.BlockSpec(shape, lambda b, s: (0, 0),
                                    pipeline_mode=pl.Buffered(buffer_count=1))
        else:
            def inv_spec(shape):
                return pl.BlockSpec(shape, lambda b, s: (0, 0))

        in_specs = [
            pl.BlockSpec((None, ts, din), lambda b, s: (b, s, 0)),     # x tile
            inv_spec((din, hidden)),                                   # w1 (grid-invariant)
            inv_spec((1, hidden)),                                     # b1
            inv_spec((1, hidden)),                                     # ln1 gamma
            inv_spec((1, hidden)),                                     # ln1 beta
            inv_spec((hidden, d_model)),                               # w2 (grid-invariant)
            inv_spec((1, d_model)),                                    # b2
            inv_spec((1, d_model)),                                    # ln2 gamma
            inv_spec((1, d_model)),                                    # ln2 beta
            pl.BlockSpec((None, 1, d_model), lambda b, s: (b, 0, 0)),  # pe row per batch
        ]
        out_spec = pl.BlockSpec((None, ts, d_model), lambda b, s: (b, s, 0))

        return pl.pallas_call(
            kernel,
            out_shape=jax.ShapeDtypeStruct((B, S, d_model), jnp.float32),
            grid_spec=pltpu.PrefetchScalarGridSpec(
                num_scalar_prefetch=0,
                grid=grid,
                in_specs=in_specs,
                out_specs=out_spec,
            ),
            compiler_params=pltpu.CompilerParams(
                dimension_semantics=("parallel", "parallel"),
                vmem_limit_bytes=vmem_limit,
            ),
            cost_estimate=cost,
        )

    args = (x, w1, b1, g1, be1, w2, b2, g2, be2, pe3)
    try:
        out = _build(True)(*args)
    except Exception:
        # pipeline_mode / pl.Buffered not supported on this JAX build -> default
        # double-buffered specs (identical semantics, slightly more VMEM).
        out = _build(False)(*args)
    return out


def make_params(key, input_dim, d_model):
    """Deterministic synthetic parameters matching the PyTorch module shapes.
    Linear weights are stored pre-transposed as (in_features, out_features), float32."""
    hidden = 2 * d_model
    k1, k2, k3, k4 = jax.random.split(key, 4)
    return {
        "w1": (jax.random.normal(k1, (input_dim, hidden), jnp.float32)
               / math.sqrt(input_dim)),
        "b1": jax.random.normal(k2, (1, hidden), jnp.float32) * 0.02,
        "g1": jnp.ones((1, hidden), jnp.float32),
        "be1": jnp.zeros((1, hidden), jnp.float32),
        "w2": (jax.random.normal(k3, (hidden, d_model), jnp.float32)
               / math.sqrt(hidden)),
        "b2": jax.random.normal(k4, (1, d_model), jnp.float32) * 0.02,
        "g2": jnp.ones((1, d_model), jnp.float32),
        "be2": jnp.zeros((1, d_model), jnp.float32),
    }


def make_positional_encoding(max_len, d_model):
    """Standard sin/cos table, shape [max_len, d_model] (== pe[:, 0, :] in PyTorch)."""
    position = jnp.arange(max_len, dtype=jnp.float32)[:, None]
    div_term = jnp.exp(jnp.arange(0, d_model, 2, dtype=jnp.float32)
                       * (-math.log(10000.0) / d_model))
    ang = position * div_term
    pe = jnp.zeros((max_len, d_model), jnp.float32)
    pe = pe.at[:, 0::2].set(jnp.sin(ang))
    pe = pe.at[:, 1::2].set(jnp.cos(ang))
    return pe


def reference_forward(x, params, pe_rows, match_kernel_precision=True):
    """Pure-JAX reference.  With match_kernel_precision=True the matmul operands are
    cast to bf16 (f32 accumulate), mirroring the kernel's MXU precision."""
    cast = (lambda a: a.astype(jnp.bfloat16)) if match_kernel_precision else (lambda a: a)
    h = jnp.dot(cast(x), cast(params["w1"]),
                preferred_element_type=jnp.float32) + params["b1"]
    mu = h.mean(-1, keepdims=True)
    var = jnp.maximum((h * h).mean(-1, keepdims=True) - mu * mu, 0.0)
    h = (h - mu) * lax.rsqrt(var + EPS) * params["g1"] + params["be1"]
    h = jnp.maximum(h, 0.0)
    y = jnp.dot(cast(h), cast(params["w2"]),
                preferred_element_type=jnp.float32) + params["b2"]
    mu2 = y.mean(-1, keepdims=True)
    var2 = jnp.maximum((y * y).mean(-1, keepdims=True) - mu2 * mu2, 0.0)
    y = (y - mu2) * lax.rsqrt(var2 + EPS) * params["g2"] + params["be2"]
    return y + pe_rows[:, None, :]   # pe indexed by batch, broadcast over seq (as in PyTorch)


if __name__ == "__main__":
    B, S, INPUT_DIM, D_MODEL = 2, 8, 16, 32

    key = jax.random.PRNGKey(0)
    kx, kp = jax.random.split(key)
    x = jax.random.normal(kx, (B, S, INPUT_DIM), jnp.float32)
    params = make_params(kp, INPUT_DIM, D_MODEL)

    pe_table = make_positional_encoding(max_len=64, d_model=D_MODEL)
    pe_rows = pe_table[:B]           # pe[:x.size(0)] — exactly what the PyTorch forward does

    out = feature_embedding_forward(x, params, pe_rows)
    out = jax.block_until_ready(out)
    assert out.shape == (B, S, D_MODEL)

    # Primary correctness check: precision-matched (bf16 MXU operands, f32 everywhere else).
    ref_bf16 = reference_forward(x, params, pe_rows, match_kernel_precision=True)
    assert jnp.allclose(out, ref_bf16, atol=5e-3, rtol=1e-2), \
        "mismatch vs precision-matched reference"

    # Sanity check vs full-f32 semantics (loose tolerance for bf16 operand quantization).
    ref_f32 = reference_forward(x, params, pe_rows, match_kernel_precision=False)
    assert jnp.allclose(out, ref_f32, atol=1e-1, rtol=1e-1), \
        "mismatch vs f32 reference"

    print("KERNEL_OK")
</pallas_src>

<mosaic_0001>
module attributes {stable_mosaic.version = 11 : i64} {
  func.func @_feature_embedding_kernel(%arg0: i32, %arg1: i32, %arg2: memref<1x8x16xf32, #tpu.memory_space<vmem>>, %arg3: memref<16x64xbf16, #tpu.memory_space<vmem>>, %arg4: memref<1x64xf32, #tpu.memory_space<vmem>>, %arg5: memref<1x64xf32, #tpu.memory_space<vmem>>, %arg6: memref<1x64xf32, #tpu.memory_space<vmem>>, %arg7: memref<64x32xbf16, #tpu.memory_space<vmem>>, %arg8: memref<1x32xf32, #tpu.memory_space<vmem>>, %arg9: memref<1x32xf32, #tpu.memory_space<vmem>>, %arg10: memref<1x32xf32, #tpu.memory_space<vmem>>, %arg11: memref<1x1x32xf32, #tpu.memory_space<vmem>>, %arg12: memref<1x8x32xf32, #tpu.memory_space<vmem>>) attributes {dimension_semantics = [#tpu.dimension_semantics<parallel>, #tpu.dimension_semantics<parallel>], iteration_bounds = array<i64: 2, 1>, scalar_prefetch = 0 : i64, scratch_operands = 0 : i64, tpu.core_type = #tpu.core_type<tc>, window_params = [{transform_indices = @transform_0, window_bounds = array<i64: 1, 8, 16>}, {pipeline_mode = #tpu.pipeline_mode<synchronous>, transform_indices = @transform_1, window_bounds = array<i64: 16, 64>}, {pipeline_mode = #tpu.pipeline_mode<synchronous>, transform_indices = @transform_2, window_bounds = array<i64: 1, 64>}, {pipeline_mode = #tpu.pipeline_mode<synchronous>, transform_indices = @transform_3, window_bounds = array<i64: 1, 64>}, {pipeline_mode = #tpu.pipeline_mode<synchronous>, transform_indices = @transform_4, window_bounds = array<i64: 1, 64>}, {pipeline_mode = #tpu.pipeline_mode<synchronous>, transform_indices = @transform_5, window_bounds = array<i64: 64, 32>}, {pipeline_mode = #tpu.pipeline_mode<synchronous>, transform_indices = @transform_6, window_bounds = array<i64: 1, 32>}, {pipeline_mode = #tpu.pipeline_mode<synchronous>, transform_indices = @transform_7, window_bounds = array<i64: 1, 32>}, {pipeline_mode = #tpu.pipeline_mode<synchronous>, transform_indices = @transform_8, window_bounds = array<i64: 1, 32>}, {transform_indices = @transform_9, window_bounds = array<i64: 1, 1, 32>}, {transform_indices = @transform_10, window_bounds = array<i64: 1, 8, 32>}]} {
    %c0 = arith.constant 0 : index
    %c0_0 = arith.constant 0 : index
    %c0_1 = arith.constant 0 : index
    %0 = vector.load %arg2[%c0, %c0_0, %c0_1] : memref<1x8x16xf32, #tpu.memory_space<vmem>>, vector<1x8x16xf32>
    %1 = vector.shape_cast %0 : vector<1x8x16xf32> to vector<8x16xf32>
    %2 = arith.truncf %1 : vector<8x16xf32> to vector<8x16xbf16>
    %c0_2 = arith.constant 0 : index
    %c0_3 = arith.constant 0 : index
    %3 = vector.load %arg3[%c0_2, %c0_3] : memref<16x64xbf16, #tpu.memory_space<vmem>>, vector<16x64xbf16>
    %cst = arith.constant dense<0.000000e+00> : vector<8x64xf32>
    %4 = tpu.matmul %2, %3, %cst {dimension_numbers = #tpu.dot_dimension_numbers<[1], [0], [0], [1], [0, 0, 1, 1], [], []>} : vector<8x16xbf16>, vector<16x64xbf16>, vector<8x64xf32> -> vector<8x64xf32>
    %c0_4 = arith.constant 0 : index
    %c0_5 = arith.constant 0 : index
    %5 = vector.load %arg4[%c0_4, %c0_5] : memref<1x64xf32, #tpu.memory_space<vmem>>, vector<1x64xf32>
    %6 = vector.broadcast %5 : vector<1x64xf32> to vector<8x64xf32>
    %7 = arith.addf %4, %6 : vector<8x64xf32>
    %cst_6 = arith.constant dense<0.000000e+00> : vector<8xf32>
    %8 = vector.multi_reduction <add>, %7, %cst_6 [1] : vector<8x64xf32> to vector<8xf32>
    %9 = vector.shape_cast %8 : vector<8xf32> to vector<8x1xf32>
    %cst_7 = arith.constant 1.562500e-02 : f32
    %10 = vector.broadcast %cst_7 : f32 to vector<8x1xf32>
    %11 = arith.mulf %9, %10 : vector<8x1xf32>
    %12 = arith.mulf %7, %7 : vector<8x64xf32>
    %cst_8 = arith.constant dense<0.000000e+00> : vector<8xf32>
    %13 = vector.multi_reduction <add>, %12, %cst_8 [1] : vector<8x64xf32> to vector<8xf32>
    %14 = vector.shape_cast %13 : vector<8xf32> to vector<8x1xf32>
    %cst_9 = arith.constant 1.562500e-02 : f32
    %15 = vector.broadcast %cst_9 : f32 to vector<8x1xf32>
    %16 = arith.mulf %14, %15 : vector<8x1xf32>
    %17 = arith.mulf %11, %11 : vector<8x1xf32>
    %18 = arith.subf %16, %17 : vector<8x1xf32>
    %cst_10 = arith.constant 0.000000e+00 : f32
    %19 = vector.broadcast %cst_10 : f32 to vector<8x1xf32>
    %20 = arith.maximumf %18, %19 : vector<8x1xf32>
    %21 = vector.broadcast %11 : vector<8x1xf32> to vector<8x64xf32>
    %22 = arith.subf %7, %21 : vector<8x64xf32>
    %cst_11 = arith.constant 9.99999974E-6 : f32
    %23 = vector.broadcast %cst_11 : f32 to vector<8x1xf32>
    %24 = arith.addf %20, %23 : vector<8x1xf32>
    %25 = math.rsqrt %24 : vector<8x1xf32>
    %26 = vector.broadcast %25 : vector<8x1xf32> to vector<8x64xf32>
    %27 = arith.mulf %22, %26 : vector<8x64xf32>
    %c0_12 = arith.constant 0 : index
    %c0_13 = arith.constant 0 : index
    %28 = vector.load %arg5[%c0_12, %c0_13] : memref<1x64xf32, #tpu.memory_space<vmem>>, vector<1x64xf32>
    %29 = vector.broadcast %28 : vector<1x64xf32> to vector<8x64xf32>
    %30 = arith.mulf %27, %29 : vector<8x64xf32>
    %c0_14 = arith.constant 0 : index
    %c0_15 = arith.constant 0 : index
    %31 = vector.load %arg6[%c0_14, %c0_15] : memref<1x64xf32, #tpu.memory_space<vmem>>, vector<1x64xf32>
    %32 = vector.broadcast %31 : vector<1x64xf32> to vector<8x64xf32>
    %33 = arith.addf %30, %32 : vector<8x64xf32>
    %cst_16 = arith.constant 0.000000e+00 : f32
    %34 = vector.broadcast %cst_16 : f32 to vector<8x64xf32>
    %35 = arith.maximumf %33, %34 : vector<8x64xf32>
    %36 = arith.truncf %35 : vector<8x64xf32> to vector<8x64xbf16>
    %c0_17 = arith.constant 0 : index
    %c0_18 = arith.constant 0 : index
    %37 = vector.load %arg7[%c0_17, %c0_18] : memref<64x32xbf16, #tpu.memory_space<vmem>>, vector<64x32xbf16>
    %cst_19 = arith.constant dense<0.000000e+00> : vector<8x32xf32>
    %38 = tpu.matmul %36, %37, %cst_19 {dimension_numbers = #tpu.dot_dimension_numbers<[1], [0], [0], [1], [0, 0, 1, 1], [], []>} : vector<8x64xbf16>, vector<64x32xbf16>, vector<8x32xf32> -> vector<8x32xf32>
    %c0_20 = arith.constant 0 : index
    %c0_21 = arith.constant 0 : index
    %39 = vector.load %arg8[%c0_20, %c0_21] : memref<1x32xf32, #tpu.memory_space<vmem>>, vector<1x32xf32>
    %40 = vector.broadcast %39 : vector<1x32xf32> to vector<8x32xf32>
    %41 = arith.addf %38, %40 : vector<8x32xf32>
    %cst_22 = arith.constant dense<0.000000e+00> : vector<8xf32>
    %42 = vector.multi_reduction <add>, %41, %cst_22 [1] : vector<8x32xf32> to vector<8xf32>
    %43 = vector.shape_cast %42 : vector<8xf32> to vector<8x1xf32>
    %cst_23 = arith.constant 3.125000e-02 : f32
    %44 = vector.broadcast %cst_23 : f32 to vector<8x1xf32>
    %45 = arith.mulf %43, %44 : vector<8x1xf32>
    %46 = arith.mulf %41, %41 : vector<8x32xf32>
    %cst_24 = arith.constant dense<0.000000e+00> : vector<8xf32>
    %47 = vector.multi_reduction <add>, %46, %cst_24 [1] : vector<8x32xf32> to vector<8xf32>
    %48 = vector.shape_cast %47 : vector<8xf32> to vector<8x1xf32>
    %cst_25 = arith.constant 3.125000e-02 : f32
    %49 = vector.broadcast %cst_25 : f32 to vector<8x1xf32>
    %50 = arith.mulf %48, %49 : vector<8x1xf32>
    %51 = arith.mulf %45, %45 : vector<8x1xf32>
    %52 = arith.subf %50, %51 : vector<8x1xf32>
    %cst_26 = arith.constant 0.000000e+00 : f32
    %53 = vector.broadcast %cst_26 : f32 to vector<8x1xf32>
    %54 = arith.maximumf %52, %53 : vector<8x1xf32>
    %55 = vector.broadcast %45 : vector<8x1xf32> to vector<8x32xf32>
    %56 = arith.subf %41, %55 : vector<8x32xf32>
    %cst_27 = arith.constant 9.99999974E-6 : f32
    %57 = vector.broadcast %cst_27 : f32 to vector<8x1xf32>
    %58 = arith.addf %54, %57 : vector<8x1xf32>
    %59 = math.rsqrt %58 : vector<8x1xf32>
    %60 = vector.broadcast %59 : vector<8x1xf32> to vector<8x32xf32>
    %61 = arith.mulf %56, %60 : vector<8x32xf32>
    %c0_28 = arith.constant 0 : index
    %c0_29 = arith.constant 0 : index
    %62 = vector.load %arg9[%c0_28, %c0_29] : memref<1x32xf32, #tpu.memory_space<vmem>>, vector<1x32xf32>
    %63 = vector.broadcast %62 : vector<1x32xf32> to vector<8x32xf32>
    %64 = arith.mulf %61, %63 : vector<8x32xf32>
    %c0_30 = arith.constant 0 : index
    %c0_31 = arith.constant 0 : index
    %65 = vector.load %arg10[%c0_30, %c0_31] : memref<1x32xf32, #tpu.memory_space<vmem>>, vector<1x32xf32>
    %66 = vector.broadcast %65 : vector<1x32xf32> to vector<8x32xf32>
    %67 = arith.addf %64, %66 : vector<8x32xf32>
    %c0_32 = arith.constant 0 : index
    %c0_33 = arith.constant 0 : index
    %c0_34 = arith.constant 0 : index
    %68 = vector.load %arg11[%c0_32, %c0_33, %c0_34] : memref<1x1x32xf32, #tpu.memory_space<vmem>>, vector<1x1x32xf32>
    %69 = vector.shape_cast %68 : vector<1x1x32xf32> to vector<1x32xf32>
    %70 = vector.broadcast %69 : vector<1x32xf32> to vector<8x32xf32>
    %71 = arith.addf %67, %70 : vector<8x32xf32>
    %c0_35 = arith.constant 0 : index
    %c0_36 = arith.constant 0 : index
    %c0_37 = arith.constant 0 : index
    %72 = vector.load %arg12[%c0_35, %c0_36, %c0_37] : memref<1x8x32xf32, #tpu.memory_space<vmem>>, vector<1x8x32xf32>
    %73 = vector.shape_cast %72 : vector<1x8x32xf32> to vector<8x32xf32>
    %74 = vector.shape_cast %71 : vector<8x32xf32> to vector<1x8x32xf32>
    tpu.vector_store %arg12[%c0_35, %c0_36, %c0_37], %74 {strides = array<i32>} : memref<1x8x32xf32, #tpu.memory_space<vmem>>, vector<1x8x32xf32>,
    return
  }
  func.func @transform_0(%arg0: i32, %arg1: i32) -> (i32, i32, i32) {
    %c0_i32 = arith.constant 0 : i32
    %c0_i32_0 = arith.constant 0 : i32
    return %arg0, %arg1, %c0_i32 : i32, i32, i32
  }
  func.func @transform_1(%arg0: i32, %arg1: i32) -> (i32, i32) {
    %c0_i32 = arith.constant 0 : i32
    %c0_i32_0 = arith.constant 0 : i32
    %c0_i32_1 = arith.constant 0 : i32
    return %c0_i32, %c0_i32_0 : i32, i32
  }
  func.func @transform_2(%arg0: i32, %arg1: i32) -> (i32, i32) {
    %c0_i32 = arith.constant 0 : i32
    %c0_i32_0 = arith.constant 0 : i32
    %c0_i32_1 = arith.constant 0 : i32
    return %c0_i32, %c0_i32_0 : i32, i32
  }
  func.func @transform_3(%arg0: i32, %arg1: i32) -> (i32, i32) {
    %c0_i32 = arith.constant 0 : i32
    %c0_i32_0 = arith.constant 0 : i32
    %c0_i32_1 = arith.constant 0 : i32
    return %c0_i32, %c0_i32_0 : i32, i32
  }
  func.func @transform_4(%arg0: i32, %arg1: i32) -> (i32, i32) {
    %c0_i32 = arith.constant 0 : i32
    %c0_i32_0 = arith.constant 0 : i32
    %c0_i32_1 = arith.constant 0 : i32
    return %c0_i32, %c0_i32_0 : i32, i32
  }
  func.func @transform_5(%arg0: i32, %arg1: i32) -> (i32, i32) {
    %c0_i32 = arith.constant 0 : i32
    %c0_i32_0 = arith.constant 0 : i32
    %c0_i32_1 = arith.constant 0 : i32
    return %c0_i32, %c0_i32_0 : i32, i32
  }
  func.func @transform_6(%arg0: i32, %arg1: i32) -> (i32, i32) {
    %c0_i32 = arith.constant 0 : i32
    %c0_i32_0 = arith.constant 0 : i32
    %c0_i32_1 = arith.constant 0 : i32
    return %c0_i32, %c0_i32_0 : i32, i32
  }
  func.func @transform_7(%arg0: i32, %arg1: i32) -> (i32, i32) {
    %c0_i32 = arith.constant 0 : i32
    %c0_i32_0 = arith.constant 0 : i32
    %c0_i32_1 = arith.constant 0 : i32
    return %c0_i32, %c0_i32_0 : i32, i32
  }
  func.func @transform_8(%arg0: i32, %arg1: i32) -> (i32, i32) {
    %c0_i32 = arith.constant 0 : i32
    %c0_i32_0 = arith.constant 0 : i32
    %c0_i32_1 = arith.constant 0 : i32
    return %c0_i32, %c0_i32_0 : i32, i32
  }
  func.func @transform_9(%arg0: i32, %arg1: i32) -> (i32, i32, i32) {
    %c0_i32 = arith.constant 0 : i32
    %c0_i32_0 = arith.constant 0 : i32
    %c0_i32_1 = arith.constant 0 : i32
    return %arg0, %c0_i32, %c0_i32_0 : i32, i32, i32
  }
  func.func @transform_10(%arg0: i32, %arg1: i32) -> (i32, i32, i32) {
    %c0_i32 = arith.constant 0 : i32
    %c0_i32_0 = arith.constant 0 : i32
    return %arg0, %arg1, %c0_i32 : i32, i32, i32
  }
}

module attributes {stable_mosaic.version = 11 : i64} {
  func.func @_feature_embedding_kernel(%arg0: i32, %arg1: i32, %arg2: memref<1x8x16xf32, #tpu.memory_space<vmem>>, %arg3: memref<16x64xbf16, #tpu.memory_space<vmem>>, %arg4: memref<1x64xf32, #tpu.memory_space<vmem>>, %arg5: memref<1x64xf32, #tpu.memory_space<vmem>>, %arg6: memref<1x64xf32, #tpu.memory_space<vmem>>, %arg7: memref<64x32xbf16, #tpu.memory_space<vmem>>, %arg8: memref<1x32xf32, #tpu.memory_space<vmem>>, %arg9: memref<1x32xf32, #tpu.memory_space<vmem>>, %arg10: memref<1x32xf32, #tpu.memory_space<vmem>>, %arg11: memref<1x1x32xf32, #tpu.memory_space<vmem>>, %arg12: memref<1x8x32xf32, #tpu.memory_space<vmem>>) attributes {dimension_semantics = [#tpu.dimension_semantics<parallel>, #tpu.dimension_semantics<parallel>], iteration_bounds = array<i64: 2, 1>, scalar_prefetch = 0 : i64, scratch_operands = 0 : i64, tpu.core_type = #tpu.core_type<tc>, window_params = [{transform_indices = @transform_0, window_bounds = array<i64: 1, 8, 16>}, {pipeline_mode = #tpu.pipeline_mode<synchronous>, transform_indices = @transform_1, window_bounds = array<i64: 16, 64>}, {pipeline_mode = #tpu.pipeline_mode<synchronous>, transform_indices = @transform_2, window_bounds = array<i64: 1, 64>}, {pipeline_mode = #tpu.pipeline_mode<synchronous>, transform_indices = @transform_3, window_bounds = array<i64: 1, 64>}, {pipeline_mode = #tpu.pipeline_mode<synchronous>, transform_indices = @transform_4, window_bounds = array<i64: 1, 64>}, {pipeline_mode = #tpu.pipeline_mode<synchronous>, transform_indices = @transform_5, window_bounds = array<i64: 64, 32>}, {pipeline_mode = #tpu.pipeline_mode<synchronous>, transform_indices = @transform_6, window_bounds = array<i64: 1, 32>}, {pipeline_mode = #tpu.pipeline_mode<synchronous>, transform_indices = @transform_7, window_bounds = array<i64: 1, 32>}, {pipeline_mode = #tpu.pipeline_mode<synchronous>, transform_indices = @transform_8, window_bounds = array<i64: 1, 32>}, {transform_indices = @transform_9, window_bounds = array<i64: 1, 1, 32>}, {transform_indices = @transform_10, window_bounds = array<i64: 1, 8, 32>}]} {
    %c0 = arith.constant 0 : index
    %c0_0 = arith.constant 0 : index
    %c0_1 = arith.constant 0 : index
    %0 = vector.load %arg2[%c0, %c0_0, %c0_1] : memref<1x8x16xf32, #tpu.memory_space<vmem>>, vector<1x8x16xf32>
    %1 = vector.shape_cast %0 : vector<1x8x16xf32> to vector<8x16xf32>
    %2 = arith.truncf %1 : vector<8x16xf32> to vector<8x16xbf16>
    %c0_2 = arith.constant 0 : index
    %c0_3 = arith.constant 0 : index
    %3 = vector.load %arg3[%c0_2, %c0_3] : memref<16x64xbf16, #tpu.memory_space<vmem>>, vector<16x64xbf16>
    %cst = arith.constant dense<0.000000e+00> : vector<8x64xf32>
    %4 = tpu.matmul %2, %3, %cst {dimension_numbers = #tpu.dot_dimension_numbers<[1], [0], [0], [1], [0, 0, 1, 1], [], []>} : vector<8x16xbf16>, vector<16x64xbf16>, vector<8x64xf32> -> vector<8x64xf32>
    %c0_4 = arith.constant 0 : index
    %c0_5 = arith.constant 0 : index
    %5 = vector.load %arg4[%c0_4, %c0_5] : memref<1x64xf32, #tpu.memory_space<vmem>>, vector<1x64xf32>
    %6 = vector.broadcast %5 : vector<1x64xf32> to vector<8x64xf32>
    %7 = arith.addf %4, %6 : vector<8x64xf32>
    %cst_6 = arith.constant dense<0.000000e+00> : vector<8xf32>
    %8 = vector.multi_reduction <add>, %7, %cst_6 [1] : vector<8x64xf32> to vector<8xf32>
    %9 = vector.shape_cast %8 : vector<8xf32> to vector<8x1xf32>
    %cst_7 = arith.constant 1.562500e-02 : f32
    %10 = vector.broadcast %cst_7 : f32 to vector<8x1xf32>
    %11 = arith.mulf %9, %10 : vector<8x1xf32>
    %12 = arith.mulf %7, %7 : vector<8x64xf32>
    %cst_8 = arith.constant dense<0.000000e+00> : vector<8xf32>
    %13 = vector.multi_reduction <add>, %12, %cst_8 [1] : vector<8x64xf32> to vector<8xf32>
    %14 = vector.shape_cast %13 : vector<8xf32> to vector<8x1xf32>
    %cst_9 = arith.constant 1.562500e-02 : f32
    %15 = vector.broadcast %cst_9 : f32 to vector<8x1xf32>
    %16 = arith.mulf %14, %15 : vector<8x1xf32>
    %17 = arith.mulf %11, %11 : vector<8x1xf32>
    %18 = arith.subf %16, %17 : vector<8x1xf32>
    %cst_10 = arith.constant 0.000000e+00 : f32
    %19 = vector.broadcast %cst_10 : f32 to vector<8x1xf32>
    %20 = arith.maximumf %18, %19 : vector<8x1xf32>
    %21 = vector.broadcast %11 : vector<8x1xf32> to vector<8x64xf32>
    %22 = arith.subf %7, %21 : vector<8x64xf32>
    %cst_11 = arith.constant 9.99999974E-6 : f32
    %23 = vector.broadcast %cst_11 : f32 to vector<8x1xf32>
    %24 = arith.addf %20, %23 : vector<8x1xf32>
    %25 = math.rsqrt %24 : vector<8x1xf32>
    %26 = vector.broadcast %25 : vector<8x1xf32> to vector<8x64xf32>
    %27 = arith.mulf %22, %26 : vector<8x64xf32>
    %c0_12 = arith.constant 0 : index
    %c0_13 = arith.constant 0 : index
    %28 = vector.load %arg5[%c0_12, %c0_13] : memref<1x64xf32, #tpu.memory_space<vmem>>, vector<1x64xf32>
    %29 = vector.broadcast %28 : vector<1x64xf32> to vector<8x64xf32>
    %30 = arith.mulf %27, %29 : vector<8x64xf32>
    %c0_14 = arith.constant 0 : index
    %c0_15 = arith.constant 0 : index
    %31 = vector.load %arg6[%c0_14, %c0_15] : memref<1x64xf32, #tpu.memory_space<vmem>>, vector<1x64xf32>
    %32 = vector.broadcast %31 : vector<1x64xf32> to vector<8x64xf32>
    %33 = arith.addf %30, %32 : vector<8x64xf32>
    %cst_16 = arith.constant 0.000000e+00 : f32
    %34 = vector.broadcast %cst_16 : f32 to vector<8x64xf32>
    %35 = arith.maximumf %33, %34 : vector<8x64xf32>
    %36 = arith.truncf %35 : vector<8x64xf32> to vector<8x64xbf16>
    %c0_17 = arith.constant 0 : index
    %c0_18 = arith.constant 0 : index
    %37 = vector.load %arg7[%c0_17, %c0_18] : memref<64x32xbf16, #tpu.memory_space<vmem>>, vector<64x32xbf16>
    %cst_19 = arith.constant dense<0.000000e+00> : vector<8x32xf32>
    %38 = tpu.matmul %36, %37, %cst_19 {dimension_numbers = #tpu.dot_dimension_numbers<[1], [0], [0], [1], [0, 0, 1, 1], [], []>} : vector<8x64xbf16>, vector<64x32xbf16>, vector<8x32xf32> -> vector<8x32xf32>
    %c0_20 = arith.constant 0 : index
    %c0_21 = arith.constant 0 : index
    %39 = vector.load %arg8[%c0_20, %c0_21] : memref<1x32xf32, #tpu.memory_space<vmem>>, vector<1x32xf32>
    %40 = vector.broadcast %39 : vector<1x32xf32> to vector<8x32xf32>
    %41 = arith.addf %38, %40 : vector<8x32xf32>
    %cst_22 = arith.constant dense<0.000000e+00> : vector<8xf32>
    %42 = vector.multi_reduction <add>, %41, %cst_22 [1] : vector<8x32xf32> to vector<8xf32>
    %43 = vector.shape_cast %42 : vector<8xf32> to vector<8x1xf32>
    %cst_23 = arith.constant 3.125000e-02 : f32
    %44 = vector.broadcast %cst_23 : f32 to vector<8x1xf32>
    %45 = arith.mulf %43, %44 : vector<8x1xf32>
    %46 = arith.mulf %41, %41 : vector<8x32xf32>
    %cst_24 = arith.constant dense<0.000000e+00> : vector<8xf32>
    %47 = vector.multi_reduction <add>, %46, %cst_24 [1] : vector<8x32xf32> to vector<8xf32>
    %48 = vector.shape_cast %47 : vector<8xf32> to vector<8x1xf32>
    %cst_25 = arith.constant 3.125000e-02 : f32
    %49 = vector.broadcast %cst_25 : f32 to vector<8x1xf32>
    %50 = arith.mulf %48, %49 : vector<8x1xf32>
    %51 = arith.mulf %45, %45 : vector<8x1xf32>
    %52 = arith.subf %50, %51 : vector<8x1xf32>
    %cst_26 = arith.constant 0.000000e+00 : f32
    %53 = vector.broadcast %cst_26 : f32 to vector<8x1xf32>
    %54 = arith.maximumf %52, %53 : vector<8x1xf32>
    %55 = vector.broadcast %45 : vector<8x1xf32> to vector<8x32xf32>
    %56 = arith.subf %41, %55 : vector<8x32xf32>
    %cst_27 = arith.constant 9.99999974E-6 : f32
    %57 = vector.broadcast %cst_27 : f32 to vector<8x1xf32>
    %58 = arith.addf %54, %57 : vector<8x1xf32>
    %59 = math.rsqrt %58 : vector<8x1xf32>
    %60 = vector.broadcast %59 : vector<8x1xf32> to vector<8x32xf32>
    %61 = arith.mulf %56, %60 : vector<8x32xf32>
    %c0_28 = arith.constant 0 : index
    %c0_29 = arith.constant 0 : index
    %62 = vector.load %arg9[%c0_28, %c0_29] : memref<1x32xf32, #tpu.memory_space<vmem>>, vector<1x32xf32>
    %63 = vector.broadcast %62 : vector<1x32xf32> to vector<8x32xf32>
    %64 = arith.mulf %61, %63 : vector<8x32xf32>
    %c0_30 = arith.constant 0 : index
    %c0_31 = arith.constant 0 : index
    %65 = vector.load %arg10[%c0_30, %c0_31] : memref<1x32xf32, #tpu.memory_space<vmem>>, vector<1x32xf32>
    %66 = vector.broadcast %65 : vector<1x32xf32> to vector<8x32xf32>
    %67 = arith.addf %64, %66 : vector<8x32xf32>
    %c0_32 = arith.constant 0 : index
    %c0_33 = arith.constant 0 : index
    %c0_34 = arith.constant 0 : index
    %68 = vector.load %arg11[%c0_32, %c0_33, %c0_34] : memref<1x1x32xf32, #tpu.memory_space<vmem>>, vector<1x1x32xf32>
    %69 = vector.shape_cast %68 : vector<1x1x32xf32> to vector<1x32xf32>
    %70 = vector.broadcast %69 : vector<1x32xf32> to vector<8x32xf32>
    %71 = arith.addf %67, %70 : vector<8x32xf32>
    %c0_35 = arith.constant 0 : index
    %c0_36 = arith.constant 0 : index
    %c0_37 = arith.constant 0 : index
    %72 = vector.load %arg12[%c0_35, %c0_36, %c0_37] : memref<1x8x32xf32, #tpu.memory_space<vmem>>, vector<1x8x32xf32>
    %73 = vector.shape_cast %72 : vector<1x8x32xf32> to vector<8x32xf32>
    %74 = vector.shape_cast %71 : vector<8x32xf32> to vector<1x8x32xf32>
    tpu.vector_store %arg12[%c0_35, %c0_36, %c0_37], %74 {strides = array<i32>} : memref<1x8x32xf32, #tpu.memory_space<vmem>>, vector<1x8x32xf32>,
    return
  }
  func.func @transform_0(%arg0: i32, %arg1: i32) -> (i32, i32, i32) {
    %c0_i32 = arith.constant 0 : i32
    %c0_i32_0 = arith.constant 0 : i32
    return %arg0, %arg1, %c0_i32 : i32, i32, i32
  }
  func.func @transform_1(%arg0: i32, %arg1: i32) -> (i32, i32) {
    %c0_i32 = arith.constant 0 : i32
    %c0_i32_0 = arith.constant 0 : i32
    %c0_i32_1 = arith.constant 0 : i32
    return %c0_i32, %c0_i32_0 : i32, i32
  }
  func.func @transform_2(%arg0: i32, %arg1: i32) -> (i32, i32) {
    %c0_i32 = arith.constant 0 : i32
    %c0_i32_0 = arith.constant 0 : i32
    %c0_i32_1 = arith.constant 0 : i32
    return %c0_i32, %c0_i32_0 : i32, i32
  }
  func.func @transform_3(%arg0: i32, %arg1: i32) -> (i32, i32) {
    %c0_i32 = arith.constant 0 : i32
    %c0_i32_0 = arith.constant 0 : i32
    %c0_i32_1 = arith.constant 0 : i32
    return %c0_i32, %c0_i32_0 : i32, i32
  }
  func.func @transform_4(%arg0: i32, %arg1: i32) -> (i32, i32) {
    %c0_i32 = arith.constant 0 : i32
    %c0_i32_0 = arith.constant 0 : i32
    %c0_i32_1 = arith.constant 0 : i32
    return %c0_i32, %c0_i32_0 : i32, i32
  }
  func.func @transform_5(%arg0: i32, %arg1: i32) -> (i32, i32) {
    %c0_i32 = arith.constant 0 : i32
    %c0_i32_0 = arith.constant 0 : i32
    %c0_i32_1 = arith.constant 0 : i32
    return %c0_i32, %c0_i32_0 : i32, i32
  }
  func.func @transform_6(%arg0: i32, %arg1: i32) -> (i32, i32) {
    %c0_i32 = arith.constant 0 : i32
    %c0_i32_0 = arith.constant 0 : i32
    %c0_i32_1 = arith.constant 0 : i32
    return %c0_i32, %c0_i32_0 : i32, i32
  }
  func.func @transform_7(%arg0: i32, %arg1: i32) -> (i32, i32) {
    %c0_i32 = arith.constant 0 : i32
    %c0_i32_0 = arith.constant 0 : i32
    %c0_i32_1 = arith.constant 0 : i32
    return %c0_i32, %c0_i32_0 : i32, i32
  }
  func.func @transform_8(%arg0: i32, %arg1: i32) -> (i32, i32) {
    %c0_i32 = arith.constant 0 : i32
    %c0_i32_0 = arith.constant 0 : i32
    %c0_i32_1 = arith.constant 0 : i32
    return %c0_i32, %c0_i32_0 : i32, i32
  }
  func.func @transform_9(%arg0: i32, %arg1: i32) -> (i32, i32, i32) {
    %c0_i32 = arith.constant 0 : i32
    %c0_i32_0 = arith.constant 0 : i32
    %c0_i32_1 = arith.constant 0 : i32
    return %arg0, %c0_i32, %c0_i32_0 : i32, i32, i32
  }
  func.func @transform_10(%arg0: i32, %arg1: i32) -> (i32, i32, i32) {
    %c0_i32 = arith.constant 0 : i32
    %c0_i32_0 = arith.constant 0 : i32
    return %arg0, %arg1, %c0_i32 : i32, i32, i32
  }
}

</mosaic_0001>

<bundles_post_ra>
// kernel: tpu_custom_call.1
= control target key start
LH: loop header
LB: loop body
LE: loop exit
PB: predicated region body
PF: predicated region fallthrough
CT: control target
= control target key end

     0   :  { %s1122_s0 = inlined_call_operand.vmem [shape: f32[2,8,16], index: 0, kind: input, shape index: {}]   ;;  %s1123_s1 = inlined_call_operand.vmem [shape: bf16[16,64], index: 1, kind: input, shape index: {}]   ;;  %s1124_s2 = inlined_call_operand.vmem [shape: f32[1,64], index: 2, kind: input, shape index: {}]   ;;  %s1125_s3 = inlined_call_operand.vmem [shape: f32[1,64], index: 3, kind: input, shape index: {}]   ;;  %s1126_s4 = inlined_call_operand.vmem [shape: f32[1,64], index: 4, kind: input, shape index: {}]   ;;  %s1127_s5 = inlined_call_operand.vmem [shape: bf16[64,32], index: 5, kind: input, shape index: {}]   ;;  %s1128_s6 = inlined_call_operand.vmem [shape: f32[1,32], index: 6, kind: input, shape index: {}]   ;;  %s1129_s7 = inlined_call_operand.vmem [shape: f32[1,32], index: 7, kind: input, shape index: {}]   ;;  %s1130_s8 = inlined_call_operand.vmem [shape: f32[1,32], index: 8, kind: input, shape index: {}]   ;;  %s1131_s9 = inlined_call_operand.vmem [shape: f32[2,1,32], index: 9, kind: input, shape index: {}]   ;;  %s1132_s10 = inlined_call_operand.hbm [shape: f32[2,8,32], index: 10, kind: output, shape index: {}]  }
   0x1   :  { %1133 = sst [smem:[#allocation5_spill]] %s1122_s0 }
   0x2   :  { %1134 = sst [smem:[#allocation6_spill]] %s1123_s1 }
   0x3   :  { %1135 = sst [smem:[#allocation7_spill]] %s1124_s2 }
   0x4   :  { %1136 = sst [smem:[#allocation8_spill]] %s1125_s3 }
   0x5   :  { %15 = vsyncpa [#allocation3], 0 }
   0x6   :  { %17 = vsyncpa [#allocation3 + $0x1], 0  ;;  %s964_s13 = smov 0   ;;  %s966_s14 = smov 0  }
   0x7   :  { %s968_s15 = smov 0   ;;  %s970_s16 = smov 0  }
   0x8   :  { %s972_s17 = smov 0   ;;  %s974_s18 = smov 0  }
   0x9 LB: > { %s710_s19 = sadd.s32 4294967295, %s904_s18   ;;  %s711_s20 = sadd.s32 4294967294, %s904_s18   ;;  %s904_s18 = sphi %s974_s18, %s23_s18   ;;  %s900_s17 = sphi %s972_s17, %s1147_s17   ;;  %s896_s16 = sphi %s970_s16, %s1146_s16   ;;  %s892_s15 = sphi %s968_s15, %s1145_s15   ;;  %s888_s14 = sphi %s966_s14, %s1144_s14   ;;  %s884_s13 = sphi %s964_s13, %s1143_s13  }
   0xa   : > { %s35_s21 = sadd.s32 1, %s900_s17  ;;  %s266_s22 = sadd.s32 1, %s892_s15 }
   0xb   : > { %p37_p0 = scmp.ge.s32.totalorder %s35_s21, 2  ;;  %p276_p1 = scmp.ne.s32.totalorder %s892_s15, %s888_s14 }
   0xc   : > { %p277_p2 = scmp.eq.s32.totalorder %s710_s19, 1  ;;  %p282_p3 = scmp.ne.s32.totalorder %s888_s14, %s884_s13 }
   0xd   : > { %s1149_s21 = smov (%p37_p0, %s35_s21), 0  ;;  %p283_p5 = scmp.eq.s32.totalorder %s711_s20, 1 }
   0xe   : > { %p1004_p4 = por %p277_p2, %p276_p1  ;;  %s261_s24 = ssub.s32 %s900_s17, %s1149_s21 }
   0xf   : > { %p714_p6 = scmp.ge.s32.totalorder %s904_s18, 1  ;;  %p264_p7 = scmp.eq.s32.totalorder %s261_s24, 0 }
  0x10   : > { %p1011_p8 = por %p283_p5, %p282_p3  ;;  %p341_p9 = scmp.lt.s32.totalorder %s904_s18, 3 }
  0x11   : > { %s1017_s26 = scalar_select %p264_p7, %s892_s15, %s266_s22  }
  0x12   : > { %p342_p10 = pnand %p714_p6, %p341_p9 }
  0x13   : > { %s1139_s1 = sld [smem:[#allocation6_spill]] (!%p342_p10)  ;;  %v906_v1 = vmov (!%p342_p10), 0.0   ;;  %p384_p11 = scmp.lt.s32.totalorder (!%p342_p10), %s896_s16, 1  ;;  %vm907_vm0 = vmmov (!%p342_p10), 0   ;;  %vm412_vm1 = vcmask (!%p342_p10), 130048   ;;  %vm456_vm2 = vcmask (!%p342_p10), 523264  }
  0x14   : > { %345 = sbr.rel (%p342_p10) target bundleno = 826 (0x33a), region = 60  ;;  %742 = vmatprep.subr.bf16.mxu0 (!%p342_p10), %v906_v1  ;;  %748 = vmatprep.subr.bf16.mxu1 (!%p342_p10), %v906_v1  ;;  %s1140_s0 = sld [smem:[#allocation5_spill]] (!%p342_p10)  ;;  %v818_v13 = vld [vmem:[%s1127_s5] sm:$0xff] (!%p342_p10)   ;;  %v819_v14 = vld [vmem:[%s1127_s5 + $0x8] sm:$0xff] (!%p342_p10)   ;;  %v820_v15 = vld [vmem:[%s1127_s5 + $0x10] sm:$0xff] (!%p342_p10)   ;;  %vm573_vm3 = vcmask (!%p342_p10), 261120  }
  0x15   : > { %744 = vmatprep.mubr.msk.bf16.mxu0 (!%p342_p10), %vm907_vm0, %v906_v1  ;;  %756 = vmatprep.mubr.msk.bf16.mxu1 (!%p342_p10), %vm907_vm0, %v906_v1  ;;  %s1141_s2 = sld [smem:[#allocation7_spill]] (!%p342_p10)  ;;  %v821_v16 = vld [vmem:[%s1127_s5 + $0x18] sm:$0xff] (!%p342_p10)   ;;  %s1142_s3 = sld [smem:[#allocation8_spill]] (!%p342_p10)  ;;  %v721_v29 = vld [vmem:[%s1126_s4] ss:$0 sm:$0xff] (!%p342_p10) }
  0x16   : > { %749 = vmatpush3.bf16.msra.mxu1 (!%p342_p10), %v818_v13  ;;  %v722_v34 = vld [vmem:[%s1128_s6] ss:$0 sm:$0xff] (!%p342_p10)  ;;  %s381_s12 = sand.u32 (!%p342_p10), 1, %s888_s14  }
  0x17   : > { %750 = vmatprep.subr.bf16.mxu1 (!%p342_p10), %v906_v1  ;;  %v728_v53 = vld [vmem:[%s1129_s7] ss:$0 sm:$0xff] (!%p342_p10) }
  0x18   : > { %v729_v55 = vld [vmem:[%s1130_s8] ss:$0 sm:$0xff] (!%p342_p10) }
  0x19   : > { %v817_v0 = vld [vmem:[%s1139_s1] sm:$0xff] (!%p342_p10)  }
  0x1a   : > { %743 = vmatpush3.bf16.msra.mxu0 (!%p342_p10), %v817_v0  ;;  %751 = vmatpush3.bf16.msra.mxu1 (!%p342_p10), %v819_v14 }
  0x1b   : > { %s1024_s29 = scalar_select %p384_p11, %s896_s16, 1  ;;  %v717_v4 = vld [vmem:[%s1141_s2] ss:$0 sm:$0xff]  ;;  %752 = vmatprep.subr.bf16.mxu1 %v906_v1 }
  0x1c   : > { %v720_v27 = vld [vmem:[%s1142_s3] ss:$0 sm:$0xff] }
  0x1d   : > { %s716_s30 = sshll.u32 %s1024_s29, 3  ;;  %s393_s28 = scalar_lea.vmem %s1131_s9, %s1024_s29 }
  0x1e   : > { %s390_s19 = scalar_lea.vmem %s1140_s0, %s716_s30  ;;  %753 = vmatpush3.bf16.msra.mxu1 %v820_v15  ;;  %v730_v57 = vld [vmem:[%s393_s28] ss:$0 sm:$0xff]  ;;  %s732_s0 = sshll.u32 %s896_s16, 7 }
  0x1f   : > { %v395_v2 = vld [vmem:[%s390_s19] sm:$0xff]  ;;  %754 = vmatprep.subr.bf16.mxu1 %v906_v1  ;;  %s715_s19 = sshll.u32 %s381_s12, 3  ;;  %s1074_s22 = scalar_lea.hbm %s1132_s10, %s732_s0 }
  0x20   : > { %v396_v3 = vpack.c.bf16 %v395_v2, %v395_v2  ;;  %s383_s1 = scalar_lea.vmem [#allocation2], %s715_s19  ;;  %s616_s29 = scalar_lea.sflag [#allocation3], %s381_s12 }
  0x21   : > { %s630_s2 = sshll.u32 %s383_s1, 4  ;;  %s908_s16 = smov [#allocation2]   ;;  %s1076_s2 = int_to_ptr.vmem [resolvable:$true] %s630_s2 }
  0x22   : > { %745 = vmatmul.mubr.msk.bf16.vlgmr.msra.gmra.mrb[0].mxu0 %vm412_vm1, %v396_v3  ;;  %755 = vmatpush3.bf16.msra.mxu1 %v821_v16  ;;  %s826_s24 = scalar_lea.vmem %s1076_s2, 128  ;;  %s830_s19 = sshll.u32 %s908_s16, 4  ;;  %s831_s19 = int_to_ptr.vmem [resolvable:$false] %s830_s19 }
  0x23   : > { %p827_p12 = scmp.ne.s32.totalorder %s1076_s2, %s826_s24  ;;  %s832_s27 = scalar_lea.vmem %s831_s19, 256 }
  0x24   : > { %p833_p1 = scmp.lt.s32.totalorder %s1076_s2, %s831_s19  ;;  %p834_p2 = scmp.lt.s32.totalorder %s832_s27, %s826_s24 }
  0x25   : > { %p828_p13 = pnand %p827_p12, %p1004_p4 }
  0x26   : > { %p835_p3 = por %p834_p2, %p833_p1 }
  0x27   : > { %p829_p0 = pneg %p828_p13 }
  0x29   : > { %p836_p5 = pnand %p835_p3, %p829_p0 }
  0xf5   : > { %v450_v5 = vpop.f32.mrb[0].mxu0 }
  0xf6   : > { %v451_v6 = vadd.f32 %v717_v4, %v450_v5  ;;  %v746_v7 = vpop.f32.mrb[1].mxu0 }
  0xf7   : > { %v453_v8 = vpop.f32.mrb[2].mxu0 }
  0xf8   : > { %v747_v9 = vpop.f32.mrb[3].mxu0  ;;  %v457_v10 = vsel %vm456_vm2, %v451_v6, 0.0  ;;  %v461_v11 = vmul.f32 %v451_v6, %v451_v6 }
  0xf9   : > { %458 = vadd.xlane.f32.xlu0 %v457_v10 }
  0xfa   : > { %v462_v12 = vsel %vm456_vm2, %v461_v11, 0.0 }
  0xfd   : > { %463 = vadd.xlane.f32.xlu0 %v462_v12 }
 0x186   : > { %v459_v17 = vpop.xlane.xlu0 %458 }
 0x187   : > { %v460_v18 = vmul.f32 0.015625, %v459_v17 }
 0x189   : > { %v466_v20 = vmul.f32 %v460_v18, %v460_v18  ;;  %v469_v25 = vsub.f32 %v451_v6, %v460_v18 }
 0x18a   : > { %v464_v19 = vpop.xlane.xlu0 %463 }
 0x18b   : > { %v465_v21 = vmul.f32 0.015625, %v464_v19 }
 0x18d   : > { %v467_v22 = vsub.f32 %v465_v21, %v466_v20 }
 0x18f   : > { %v468_v23 = vmax.f32 %v467_v22, 0.0 }
 0x191   : > { %v470_v24 = vadd.f32 1e-05, %v468_v23 }
 0x193   : > { %822 = vrsqrt.f32 %v470_v24 }
 0x19d   : > { %v823_v26 = vpop.eup %822 }
 0x19e   : > { %v472_v28 = vmul.f32 %v823_v26, %v469_v25 }
 0x1a0   : > { %v480_v30 = vmul.f32 %v720_v27, %v472_v28 }
 0x1a2   : > { %v488_v31 = vadd.f32 %v721_v29, %v480_v30 }
 0x1a4   : > { %v489_v32 = vmax.f32 %v488_v31, 0.0 }
 0x1a6   : > { %v490_v33 = vpack.c.bf16 %v489_v32, %v489_v32 }
 0x1a8   : > { %757 = vmatmul.mubr.msk.bf16.vlgmr.msra.gmra.mrb[0].mxu1 %vm456_vm2, %v490_v33 }
 0x27b   : > { %v567_v35 = vpop.f32.mrb[0].mxu1 }
 0x27c   : > { %v568_v36 = vadd.f32 %v722_v34, %v567_v35  ;;  %v758_v37 = vpop.f32.mrb[1].mxu1 }
 0x27d   : > { %v570_v38 = vpop.f32.mrb[2].mxu1 }
 0x27e   : > { %v759_v39 = vpop.f32.mrb[3].mxu1  ;;  %v574_v40 = vsel %vm573_vm3, %v568_v36, 0.0  ;;  %v578_v41 = vmul.f32 %v568_v36, %v568_v36 }
 0x27f   : > { %575 = vadd.xlane.f32.xlu1 %v574_v40 }
 0x280   : > { %v579_v42 = vsel %vm573_vm3, %v578_v41, 0.0 }
 0x283   : > { %580 = vadd.xlane.f32.xlu1 %v579_v42 }
 0x30c   : > { %v576_v43 = vpop.xlane.xlu1 %575 }
 0x30d   : > { %v577_v44 = vmul.f32 0.03125, %v576_v43 }
 0x30f   : > { %v583_v46 = vmul.f32 %v577_v44, %v577_v44  ;;  %v586_v51 = vsub.f32 %v568_v36, %v577_v44 }
 0x310   : > { %v581_v45 = vpop.xlane.xlu1 %580 }
 0x311   : > { %v582_v47 = vmul.f32 0.03125, %v581_v45 }
 0x313   : > { %v584_v48 = vsub.f32 %v582_v47, %v583_v46 }
 0x315   : > { %v585_v49 = vmax.f32 %v584_v48, 0.0 }
 0x317   : > { %v587_v50 = vadd.f32 1e-05, %v585_v49 }
 0x319   : > { %824 = vrsqrt.f32 %v587_v50 }
 0x323   : > { %v825_v52 = vpop.eup %824 }
 0x324   : > { %v589_v54 = vmul.f32 %v825_v52, %v586_v51 }
 0x326   : > { %v597_v56 = vmul.f32 %v728_v53, %v589_v54 }
 0x328   : > { %v605_v58 = vadd.f32 %v729_v55, %v597_v56 }
 0x32a   : > { %v613_v59 = vadd.f32 %v730_v57, %v605_v58 }
 0x32c   : > { %614 = vst.msk [vmem:[%s383_s1] sm:$0xff] %vm573_vm3, %v613_v59 }
 0x32d   : > { %839 = shalt.err (!%p836_p5)
}
 0x32e   : > { %s840_s0 = scalar_lea.hbm %s1074_s22, 128  ;;  %s844_s12 = scalar_lea.hbm %s1132_s10, 256 }
 0x32f   : > { %p841_p6 = scmp.ne.s32.totalorder %s1074_s22, %s840_s0  ;;  %p845_p10 = scmp.lt.u32.totalorder %s1074_s22, %s1132_s10 }
 0x330   : > { %p846_p11 = scmp.lt.u32.totalorder %s844_s12, %s840_s0  ;;  %p848_p13 = scmp.lt.u32.totalorder %s840_s0, %s1074_s22 }
 0x331   : > { %p842_p7 = pnand %p841_p6, %p1004_p4 }
 0x332   : > { %p847_p12 = por %p846_p11, %p845_p10 }
 0x333   : > { %p843_p9 = pneg %p842_p7 }
 0x334   : > { %p849_p0 = por %p848_p13, %p847_p12 }
 0x336   : > { %p850_p1 = pnand %p849_p0, %p843_p9 }
 0x338   : > { %853 = shalt.err (!%p850_p1)
}
 0x339   : > { %760 = dma.vmem_to_hbm [thread:$0]  (%p1004_p4), %s1076_s2, 128, %s1074_s22, %s616_s29  }
 0x33a PF: > { %p766_p2 = scmp.ge.s32.totalorder %s904_s18, 2  ;;  %s642_s11 = sand.u32 1, %s884_s13  }
 0x33b   : > { %s643_s20 = scalar_lea.sflag [#allocation3], %s642_s11 }
 0x33c   : > { %p763_p3 = pnand %p766_p2, %p1011_p8 }
 0x33e   : > { %879 = dma.done.wait (!%p763_p3), %s643_s20, 128  }
 0x33f   : > { %881 = vsyncadd (!%p763_p3), %s643_s20, 4294967168  ;;  %s23_s18 = sadd.s32 1, %s904_s18   ;;  %s1143_s13 = smov %s888_s14 }
 0x340   : > { %p20_p5 = scmp.ge.s32.totalorder %s23_s18, 4   ;;  %s1144_s14 = smov %s892_s15 }
 0x341   : > { %s1145_s15 = smov %s1017_s26  ;;  %s1146_s16 = smov %s900_s17 }
 0x342   : > { %s1147_s17 = smov %s1149_s21  ;;  %22 = sbr.rel (!%p20_p5) target bundleno = 9 (0x9), region = 98 }
 0x349   :  { %648 = vsyncpa [#allocation3], 1 }
 0x34a   :  { %650 = vsyncpa [#allocation3 + $0x1], 1 }

// kernel: tpu_custom_call.1
= control target key start
LH: loop header
LB: loop body
LE: loop exit
PB: predicated region body
PF: predicated region fallthrough
CT: control target
= control target key end

     0   :  { %s1122_s0 = inlined_call_operand.vmem [shape: f32[2,8,16], index: 0, kind: input, shape index: {}]   ;;  %s1123_s1 = inlined_call_operand.vmem [shape: bf16[16,64], index: 1, kind: input, shape index: {}]   ;;  %s1124_s2 = inlined_call_operand.vmem [shape: f32[1,64], index: 2, kind: input, shape index: {}]   ;;  %s1125_s3 = inlined_call_operand.vmem [shape: f32[1,64], index: 3, kind: input, shape index: {}]   ;;  %s1126_s4 = inlined_call_operand.vmem [shape: f32[1,64], index: 4, kind: input, shape index: {}]   ;;  %s1127_s5 = inlined_call_operand.vmem [shape: bf16[64,32], index: 5, kind: input, shape index: {}]   ;;  %s1128_s6 = inlined_call_operand.vmem [shape: f32[1,32], index: 6, kind: input, shape index: {}]   ;;  %s1129_s7 = inlined_call_operand.vmem [shape: f32[1,32], index: 7, kind: input, shape index: {}]   ;;  %s1130_s8 = inlined_call_operand.vmem [shape: f32[1,32], index: 8, kind: input, shape index: {}]   ;;  %s1131_s9 = inlined_call_operand.vmem [shape: f32[2,1,32], index: 9, kind: input, shape index: {}]   ;;  %s1132_s10 = inlined_call_operand.hbm [shape: f32[2,8,32], index: 10, kind: output, shape index: {}]  }
   0x1   :  { %1133 = sst [smem:[#allocation5_spill]] %s1122_s0 }
   0x2   :  { %1134 = sst [smem:[#allocation6_spill]] %s1123_s1 }
   0x3   :  { %1135 = sst [smem:[#allocation7_spill]] %s1124_s2 }
   0x4   :  { %1136 = sst [smem:[#allocation8_spill]] %s1125_s3 }
   0x5   :  { %15 = vsyncpa [#allocation3], 0 }
   0x6   :  { %17 = vsyncpa [#allocation3 + $0x1], 0  ;;  %s964_s13 = smov 0   ;;  %s966_s14 = smov 0  }
   0x7   :  { %s968_s15 = smov 0   ;;  %s970_s16 = smov 0  }
   0x8   :  { %s972_s17 = smov 0   ;;  %s974_s18 = smov 0  }
   0x9 LB: > { %s710_s19 = sadd.s32 4294967295, %s904_s18   ;;  %s711_s20 = sadd.s32 4294967294, %s904_s18   ;;  %s904_s18 = sphi %s974_s18, %s23_s18   ;;  %s900_s17 = sphi %s972_s17, %s1147_s17   ;;  %s896_s16 = sphi %s970_s16, %s1146_s16   ;;  %s892_s15 = sphi %s968_s15, %s1145_s15   ;;  %s888_s14 = sphi %s966_s14, %s1144_s14   ;;  %s884_s13 = sphi %s964_s13, %s1143_s13  }
   0xa   : > { %s35_s21 = sadd.s32 1, %s900_s17  ;;  %s266_s22 = sadd.s32 1, %s892_s15 }
   0xb   : > { %p37_p0 = scmp.ge.s32.totalorder %s35_s21, 2  ;;  %p276_p1 = scmp.ne.s32.totalorder %s892_s15, %s888_s14 }
   0xc   : > { %p277_p2 = scmp.eq.s32.totalorder %s710_s19, 1  ;;  %p282_p3 = scmp.ne.s32.totalorder %s888_s14, %s884_s13 }
   0xd   : > { %s1149_s21 = smov (%p37_p0, %s35_s21), 0  ;;  %p283_p5 = scmp.eq.s32.totalorder %s711_s20, 1 }
   0xe   : > { %p1004_p4 = por %p277_p2, %p276_p1  ;;  %s261_s24 = ssub.s32 %s900_s17, %s1149_s21 }
   0xf   : > { %p714_p6 = scmp.ge.s32.totalorder %s904_s18, 1  ;;  %p264_p7 = scmp.eq.s32.totalorder %s261_s24, 0 }
  0x10   : > { %p1011_p8 = por %p283_p5, %p282_p3  ;;  %p341_p9 = scmp.lt.s32.totalorder %s904_s18, 3 }
  0x11   : > { %s1017_s26 = scalar_select %p264_p7, %s892_s15, %s266_s22  }
  0x12   : > { %p342_p10 = pnand %p714_p6, %p341_p9 }
  0x13   : > { %s1139_s1 = sld [smem:[#allocation6_spill]] (!%p342_p10)  ;;  %v906_v1 = vmov (!%p342_p10), 0.0   ;;  %p384_p11 = scmp.lt.s32.totalorder (!%p342_p10), %s896_s16, 1  ;;  %vm907_vm0 = vmmov (!%p342_p10), 0   ;;  %vm412_vm1 = vcmask (!%p342_p10), 130048   ;;  %vm456_vm2 = vcmask (!%p342_p10), 523264  }
  0x14   : > { %345 = sbr.rel (%p342_p10) target bundleno = 826 (0x33a), region = 60  ;;  %742 = vmatprep.subr.bf16.mxu0 (!%p342_p10), %v906_v1  ;;  %748 = vmatprep.subr.bf16.mxu1 (!%p342_p10), %v906_v1  ;;  %s1140_s0 = sld [smem:[#allocation5_spill]] (!%p342_p10)  ;;  %v818_v13 = vld [vmem:[%s1127_s5] sm:$0xff] (!%p342_p10)   ;;  %v819_v14 = vld [vmem:[%s1127_s5 + $0x8] sm:$0xff] (!%p342_p10)   ;;  %v820_v15 = vld [vmem:[%s1127_s5 + $0x10] sm:$0xff] (!%p342_p10)   ;;  %vm573_vm3 = vcmask (!%p342_p10), 261120  }
  0x15   : > { %744 = vmatprep.mubr.msk.bf16.mxu0 (!%p342_p10), %vm907_vm0, %v906_v1  ;;  %756 = vmatprep.mubr.msk.bf16.mxu1 (!%p342_p10), %vm907_vm0, %v906_v1  ;;  %s1141_s2 = sld [smem:[#allocation7_spill]] (!%p342_p10)  ;;  %v821_v16 = vld [vmem:[%s1127_s5 + $0x18] sm:$0xff] (!%p342_p10)   ;;  %s1142_s3 = sld [smem:[#allocation8_spill]] (!%p342_p10)  ;;  %v721_v29 = vld [vmem:[%s1126_s4] ss:$0 sm:$0xff] (!%p342_p10) }
  0x16   : > { %749 = vmatpush3.bf16.msra.mxu1 (!%p342_p10), %v818_v13  ;;  %v722_v34 = vld [vmem:[%s1128_s6] ss:$0 sm:$0xff] (!%p342_p10)  ;;  %s381_s12 = sand.u32 (!%p342_p10), 1, %s888_s14  }
  0x17   : > { %750 = vmatprep.subr.bf16.mxu1 (!%p342_p10), %v906_v1  ;;  %v728_v53 = vld [vmem:[%s1129_s7] ss:$0 sm:$0xff] (!%p342_p10) }
  0x18   : > { %v729_v55 = vld [vmem:[%s1130_s8] ss:$0 sm:$0xff] (!%p342_p10) }
  0x19   : > { %v817_v0 = vld [vmem:[%s1139_s1] sm:$0xff] (!%p342_p10)  }
  0x1a   : > { %743 = vmatpush3.bf16.msra.mxu0 (!%p342_p10), %v817_v0  ;;  %751 = vmatpush3.bf16.msra.mxu1 (!%p342_p10), %v819_v14 }
  0x1b   : > { %s1024_s29 = scalar_select %p384_p11, %s896_s16, 1  ;;  %v717_v4 = vld [vmem:[%s1141_s2] ss:$0 sm:$0xff]  ;;  %752 = vmatprep.subr.bf16.mxu1 %v906_v1 }
  0x1c   : > { %v720_v27 = vld [vmem:[%s1142_s3] ss:$0 sm:$0xff] }
  0x1d   : > { %s716_s30 = sshll.u32 %s1024_s29, 3  ;;  %s393_s28 = scalar_lea.vmem %s1131_s9, %s1024_s29 }
  0x1e   : > { %s390_s19 = scalar_lea.vmem %s1140_s0, %s716_s30  ;;  %753 = vmatpush3.bf16.msra.mxu1 %v820_v15  ;;  %v730_v57 = vld [vmem:[%s393_s28] ss:$0 sm:$0xff]  ;;  %s732_s0 = sshll.u32 %s896_s16, 7 }
  0x1f   : > { %v395_v2 = vld [vmem:[%s390_s19] sm:$0xff]  ;;  %754 = vmatprep.subr.bf16.mxu1 %v906_v1  ;;  %s715_s19 = sshll.u32 %s381_s12, 3  ;;  %s1074_s22 = scalar_lea.hbm %s1132_s10, %s732_s0 }
  0x20   : > { %v396_v3 = vpack.c.bf16 %v395_v2, %v395_v2  ;;  %s383_s1 = scalar_lea.vmem [#allocation2], %s715_s19  ;;  %s616_s29 = scalar_lea.sflag [#allocation3], %s381_s12 }
  0x21   : > { %s630_s2 = sshll.u32 %s383_s1, 4  ;;  %s908_s16 = smov [#allocation2]   ;;  %s1076_s2 = int_to_ptr.vmem [resolvable:$true] %s630_s2 }
  0x22   : > { %745 = vmatmul.mubr.msk.bf16.vlgmr.msra.gmra.mrb[0].mxu0 %vm412_vm1, %v396_v3  ;;  %755 = vmatpush3.bf16.msra.mxu1 %v821_v16  ;;  %s826_s24 = scalar_lea.vmem %s1076_s2, 128  ;;  %s830_s19 = sshll.u32 %s908_s16, 4  ;;  %s831_s19 = int_to_ptr.vmem [resolvable:$false] %s830_s19 }
  0x23   : > { %p827_p12 = scmp.ne.s32.totalorder %s1076_s2, %s826_s24  ;;  %s832_s27 = scalar_lea.vmem %s831_s19, 256 }
  0x24   : > { %p833_p1 = scmp.lt.s32.totalorder %s1076_s2, %s831_s19  ;;  %p834_p2 = scmp.lt.s32.totalorder %s832_s27, %s826_s24 }
  0x25   : > { %p828_p13 = pnand %p827_p12, %p1004_p4 }
  0x26   : > { %p835_p3 = por %p834_p2, %p833_p1 }
  0x27   : > { %p829_p0 = pneg %p828_p13 }
  0x29   : > { %p836_p5 = pnand %p835_p3, %p829_p0 }
  0xf5   : > { %v450_v5 = vpop.f32.mrb[0].mxu0 }
  0xf6   : > { %v451_v6 = vadd.f32 %v717_v4, %v450_v5  ;;  %v746_v7 = vpop.f32.mrb[1].mxu0 }
  0xf7   : > { %v453_v8 = vpop.f32.mrb[2].mxu0 }
  0xf8   : > { %v747_v9 = vpop.f32.mrb[3].mxu0  ;;  %v457_v10 = vsel %vm456_vm2, %v451_v6, 0.0  ;;  %v461_v11 = vmul.f32 %v451_v6, %v451_v6 }
  0xf9   : > { %458 = vadd.xlane.f32.xlu0 %v457_v10 }
  0xfa   : > { %v462_v12 = vsel %vm456_vm2, %v461_v11, 0.0 }
  0xfd   : > { %463 = vadd.xlane.f32.xlu0 %v462_v12 }
 0x186   : > { %v459_v17 = vpop.xlane.xlu0 %458 }
 0x187   : > { %v460_v18 = vmul.f32 0.015625, %v459_v17 }
 0x189   : > { %v466_v20 = vmul.f32 %v460_v18, %v460_v18  ;;  %v469_v25 = vsub.f32 %v451_v6, %v460_v18 }
 0x18a   : > { %v464_v19 = vpop.xlane.xlu0 %463 }
 0x18b   : > { %v465_v21 = vmul.f32 0.015625, %v464_v19 }
 0x18d   : > { %v467_v22 = vsub.f32 %v465_v21, %v466_v20 }
 0x18f   : > { %v468_v23 = vmax.f32 %v467_v22, 0.0 }
 0x191   : > { %v470_v24 = vadd.f32 1e-05, %v468_v23 }
 0x193   : > { %822 = vrsqrt.f32 %v470_v24 }
 0x19d   : > { %v823_v26 = vpop.eup %822 }
 0x19e   : > { %v472_v28 = vmul.f32 %v823_v26, %v469_v25 }
 0x1a0   : > { %v480_v30 = vmul.f32 %v720_v27, %v472_v28 }
 0x1a2   : > { %v488_v31 = vadd.f32 %v721_v29, %v480_v30 }
 0x1a4   : > { %v489_v32 = vmax.f32 %v488_v31, 0.0 }
 0x1a6   : > { %v490_v33 = vpack.c.bf16 %v489_v32, %v489_v32 }
 0x1a8   : > { %757 = vmatmul.mubr.msk.bf16.vlgmr.msra.gmra.mrb[0].mxu1 %vm456_vm2, %v490_v33 }
 0x27b   : > { %v567_v35 = vpop.f32.mrb[0].mxu1 }
 0x27c   : > { %v568_v36 = vadd.f32 %v722_v34, %v567_v35  ;;  %v758_v37 = vpop.f32.mrb[1].mxu1 }
 0x27d   : > { %v570_v38 = vpop.f32.mrb[2].mxu1 }
 0x27e   : > { %v759_v39 = vpop.f32.mrb[3].mxu1  ;;  %v574_v40 = vsel %vm573_vm3, %v568_v36, 0.0  ;;  %v578_v41 = vmul.f32 %v568_v36, %v568_v36 }
 0x27f   : > { %575 = vadd.xlane.f32.xlu1 %v574_v40 }
 0x280   : > { %v579_v42 = vsel %vm573_vm3, %v578_v41, 0.0 }
 0x283   : > { %580 = vadd.xlane.f32.xlu1 %v579_v42 }
 0x30c   : > { %v576_v43 = vpop.xlane.xlu1 %575 }
 0x30d   : > { %v577_v44 = vmul.f32 0.03125, %v576_v43 }
 0x30f   : > { %v583_v46 = vmul.f32 %v577_v44, %v577_v44  ;;  %v586_v51 = vsub.f32 %v568_v36, %v577_v44 }
 0x310   : > { %v581_v45 = vpop.xlane.xlu1 %580 }
 0x311   : > { %v582_v47 = vmul.f32 0.03125, %v581_v45 }
 0x313   : > { %v584_v48 = vsub.f32 %v582_v47, %v583_v46 }
 0x315   : > { %v585_v49 = vmax.f32 %v584_v48, 0.0 }
 0x317   : > { %v587_v50 = vadd.f32 1e-05, %v585_v49 }
 0x319   : > { %824 = vrsqrt.f32 %v587_v50 }
 0x323   : > { %v825_v52 = vpop.eup %824 }
 0x324   : > { %v589_v54 = vmul.f32 %v825_v52, %v586_v51 }
 0x326   : > { %v597_v56 = vmul.f32 %v728_v53, %v589_v54 }
 0x328   : > { %v605_v58 = vadd.f32 %v729_v55, %v597_v56 }
 0x32a   : > { %v613_v59 = vadd.f32 %v730_v57, %v605_v58 }
 0x32c   : > { %614 = vst.msk [vmem:[%s383_s1] sm:$0xff] %vm573_vm3, %v613_v59 }
 0x32d   : > { %839 = shalt.err (!%p836_p5)
}
 0x32e   : > { %s840_s0 = scalar_lea.hbm %s1074_s22, 128  ;;  %s844_s12 = scalar_lea.hbm %s1132_s10, 256 }
 0x32f   : > { %p841_p6 = scmp.ne.s32.totalorder %s1074_s22, %s840_s0  ;;  %p845_p10 = scmp.lt.u32.totalorder %s1074_s22, %s1132_s10 }
 0x330   : > { %p846_p11 = scmp.lt.u32.totalorder %s844_s12, %s840_s0  ;;  %p848_p13 = scmp.lt.u32.totalorder %s840_s0, %s1074_s22 }
 0x331   : > { %p842_p7 = pnand %p841_p6, %p1004_p4 }
 0x332   : > { %p847_p12 = por %p846_p11, %p845_p10 }
 0x333   : > { %p843_p9 = pneg %p842_p7 }
 0x334   : > { %p849_p0 = por %p848_p13, %p847_p12 }
 0x336   : > { %p850_p1 = pnand %p849_p0, %p843_p9 }
 0x338   : > { %853 = shalt.err (!%p850_p1)
}
 0x339   : > { %760 = dma.vmem_to_hbm [thread:$0]  (%p1004_p4), %s1076_s2, 128, %s1074_s22, %s616_s29  }
 0x33a PF: > { %p766_p2 = scmp.ge.s32.totalorder %s904_s18, 2  ;;  %s642_s11 = sand.u32 1, %s884_s13  }
 0x33b   : > { %s643_s20 = scalar_lea.sflag [#allocation3], %s642_s11 }
 0x33c   : > { %p763_p3 = pnand %p766_p2, %p1011_p8 }
 0x33e   : > { %879 = dma.done.wait (!%p763_p3), %s643_s20, 128  }
 0x33f   : > { %881 = vsyncadd (!%p763_p3), %s643_s20, 4294967168  ;;  %s23_s18 = sadd.s32 1, %s904_s18   ;;  %s1143_s13 = smov %s888_s14 }
 0x340   : > { %p20_p5 = scmp.ge.s32.totalorder %s23_s18, 4   ;;  %s1144_s14 = smov %s892_s15 }
 0x341   : > { %s1145_s15 = smov %s1017_s26  ;;  %s1146_s16 = smov %s900_s17 }
 0x342   : > { %s1147_s17 = smov %s1149_s21  ;;  %22 = sbr.rel (!%p20_p5) target bundleno = 9 (0x9), region = 98 }
 0x349   :  { %648 = vsyncpa [#allocation3], 1 }
 0x34a   :  { %650 = vsyncpa [#allocation3 + $0x1], 1 }

</bundles_post_ra>
